<compile_context>
chip_gen: v5e
topology: v5e:2x2
jax: 0.10.0
libtpu: 0.0.40
codegen_flags: <defaults>
</compile_context>

<pallas_src>
import numpy as np

import jax
import jax.numpy as jnp
from jax.experimental import pallas as pl
from jax.experimental.pallas import tpu as pltpu


# ----------------------------------------------------------------------------
# Laplacian (same as the PyTorch helper).
# ----------------------------------------------------------------------------
def calculate_laplacian_with_self_loop(adj):
    m = adj + jnp.eye(adj.shape[0], dtype=adj.dtype)
    row_sum = jnp.sum(m, axis=1)
    d_inv_sqrt = jnp.power(row_sum, -0.5)
    d_inv_sqrt = jnp.where(jnp.isinf(d_inv_sqrt), 0.0, d_inv_sqrt)
    d = jnp.diag(d_inv_sqrt)
    return (m @ d).T @ d


# ----------------------------------------------------------------------------
# Fused TGCN cell kernel.
#
# Layouts (all prepared in the wrapper, no in-kernel transposes/reshapes):
#   lev/lod            : (N, N/2) bf16   L[:, 0::2] / L[:, 1::2]  (single copy of L)
#   p1{e,o}_{lo,hi}    : (N/2, B*H) bf16 P1 = [x|h] @ W1, split by node parity and
#                        by feature half (lo = feats [0,H), hi = [H,2H)), batch-blocked lanes
#   p2x_{e,o}          : (N/2, B*H) f32  x * W2[0,:], node-parity split
#   h_ref              : (2, N/2, B*H) f32  hidden split by node parity (aliased to output)
#   w2k                : (B*H, B*H) f32  block-diag(W2[1:,:]) over batches
#   out_ref            : (2, N/2, B*H) f32  new hidden, [even-node block, odd-node block]
# ----------------------------------------------------------------------------
def _tgcn_cell_kernel(lev_ref, lod_ref,
                      p1e_lo_ref, p1o_lo_ref, p1e_hi_ref, p1o_hi_ref,
                      p2x_e_ref, p2x_o_ref, h_ref, w2k_ref,
                      b1_lo_ref, b1_hi_ref, b2_ref,
                      out_ref, c_scratch):
    f32 = jnp.float32
    bf16 = jnp.bfloat16
    half = lev_ref.shape[1]          # N // 2

    def mm(a, b):
        return jnp.dot(a, b, preferred_element_type=f32)

    lev = lev_ref[...]               # (N, N/2)
    lod = lod_ref[...]               # (N, N/2)
    h_even = h_ref[0]                # (N/2, B*H) hidden of even nodes (loaded before any store)
    h_odd = h_ref[1]                 # (N/2, B*H) hidden of odd nodes

    # ---- graph_conv1 + sigmoid: sigmoid(L @ ([x|h] @ W1) + b1), batch-fused ----
    conc_lo = jax.nn.sigmoid(mm(lev, p1e_lo_ref[...]) + mm(lod, p1o_lo_ref[...])
                             + b1_lo_ref[...])                       # (N, B*H) feats [0,H)
    conc_hi = jax.nn.sigmoid(mm(lev, p1e_hi_ref[...]) + mm(lod, p1o_hi_ref[...])
                             + b1_hi_ref[...])                       # (N, B*H) feats [H,2H)

    # torch.chunk on the FLATTENED (B, N*2H): r = nodes [0,N/2), u = nodes [N/2,N).
    r_lo, u_lo = conc_lo[:half], conc_lo[half:]
    r_hi, u_hi = conc_hi[:half], conc_hi[half:]

    # r * hidden_state in the flat-hidden view (even nodes use feats [0,H), odd [H,2H)).
    rh_e = r_lo * h_even
    rh_o = r_hi * h_odd

    # ---- graph_conv2: P2 = [x|rh] @ W2 (block-diag weights), then L @ P2 ----
    w2k = w2k_ref[...]
    p2_e = (mm(rh_e, w2k) + p2x_e_ref[...]).astype(bf16)             # (N/2, B*H) even nodes
    p2_o = (mm(rh_o, w2k) + p2x_o_ref[...]).astype(bf16)             # (N/2, B*H) odd nodes

    # L @ P2 lands in natural node-row order; stash it and deinterleave rows by
    # node parity with a stride-2 sublane load (single small relayout point).
    c_scratch[...] = mm(lev, p2_e) + mm(lod, p2_o)                   # (N, B*H)
    b2 = b2_ref[...]
    c_e = jnp.tanh(c_scratch[pl.ds(0, half, stride=2), :] + b2)      # c at even nodes
    c_o = jnp.tanh(c_scratch[pl.ds(1, half, stride=2), :] + b2)      # c at odd nodes

    # ---- GRU update: new_h = u * h + (1 - u) * c ----
    out_ref[0] = u_lo * h_even + (1.0 - u_lo) * c_e
    out_ref[1] = u_hi * h_odd + (1.0 - u_hi) * c_o


def tgcn_cell_forward(lap, w1, b1, w2, b2, inputs, hidden_state):
    """Fused TGCNCell forward. Returns (new_hidden, new_hidden) like the module."""
    B, N = inputs.shape
    H = w2.shape[1]
    assert N % 2 == 0, "fused kernel assumes an even number of nodes"
    # TODO(synk): odd num_nodes needs the generic flattened-chunk path
    # (torch.chunk then splits node N//2 mid-feature).
    half = N // 2
    f32, bf16 = jnp.float32, jnp.bfloat16

    # Single copy of the laplacian, split by column parity, bf16.
    lev = lap[:, 0::2].astype(bf16)                               # (N, N/2)
    lod = lap[:, 1::2].astype(bf16)                               # (N, N/2)

    x3 = inputs[:, :, None]                                       # (B, N, 1)
    h3 = hidden_state.reshape(B, N, H)                            # (B, N, H)

    def to_node_major(a):  # (B, N/2, K) -> (N/2, B*K), batch-blocked lanes
        return a.transpose(1, 0, 2).reshape(a.shape[1], -1)

    # conv1 weights pre-associated in XLA: P1[b,n,:] = [x|h][b,n,:] @ W1
    p1 = x3 * w1[0][None, None, :] + jnp.einsum('bng,gf->bnf', h3, w1[1:])   # (B, N, 2H)
    p1e, p1o = p1[:, 0::2, :], p1[:, 1::2, :]
    p1e_lo = to_node_major(p1e[..., :H]).astype(bf16)
    p1e_hi = to_node_major(p1e[..., H:]).astype(bf16)
    p1o_lo = to_node_major(p1o[..., :H]).astype(bf16)
    p1o_hi = to_node_major(p1o[..., H:]).astype(bf16)

    # conv2 input-channel term x * W2[0,:], node-parity split.
    p2x = x3 * w2[0][None, None, :]                               # (B, N, H)
    p2x_e = to_node_major(p2x[:, 0::2, :]).astype(f32)
    p2x_o = to_node_major(p2x[:, 1::2, :]).astype(f32)

    # hidden state in node-parity split, batch-blocked lanes; aliased to output.
    h_eo = jnp.stack([to_node_major(h3[:, 0::2, :]),
                      to_node_major(h3[:, 1::2, :])], axis=0).astype(f32)    # (2, N/2, B*H)

    # Block-diagonal GRU-candidate weights: one wide matmul instead of a per-batch loop.
    # TODO(synk): for large B*H replace the kron by per-batch matmuls / a reshape path.
    w2k = jnp.kron(jnp.eye(B, dtype=f32), w2[1:].astype(f32))     # (B*H, B*H)

    b1_lo = jnp.tile(b1[:H], B).reshape(1, B * H).astype(f32)
    b1_hi = jnp.tile(b1[H:], B).reshape(1, B * H).astype(f32)
    b2t = jnp.tile(b2, B).reshape(1, B * H).astype(f32)

    args = (lev, lod, p1e_lo, p1o_lo, p1e_hi, p1o_hi,
            p2x_e, p2x_o, h_eo, w2k, b1_lo, b1_hi, b2t)

    # VMEM budget derived from the actual shapes (clamped to be safe on v7x's 64 MiB).
    in_bytes = sum(int(np.prod(a.shape)) * jnp.dtype(a.dtype).itemsize for a in args)
    out_bytes = 2 * half * B * H * 4
    scratch_bytes = N * B * H * 4
    vmem_limit = int(min(64 * 2 ** 20,
                         max(4 * 2 ** 20, 4 * (in_bytes + out_bytes + scratch_bytes))))

    out = pl.pallas_call(
        _tgcn_cell_kernel,
        out_shape=jax.ShapeDtypeStruct((2, half, B * H), f32),
        scratch_shapes=[pltpu.VMEM((N, B * H), f32)],
        input_output_aliases={8: 0},      # hidden (h_eo) buffer reused for the new hidden
        compiler_params=pltpu.CompilerParams(vmem_limit_bytes=vmem_limit),
    )(*args)

    # (2, N/2, B, H) [parity, pair, batch, feat] -> (B, N*H) flat hidden layout.
    new_hidden = out.reshape(2, half, B, H).transpose(2, 1, 0, 3).reshape(B, N * H)
    return new_hidden, new_hidden


# ----------------------------------------------------------------------------
# Pure-JAX transcription of the PyTorch module (correctness cross-check only).
# ----------------------------------------------------------------------------
def _graph_conv_ref(lap, weights, biases, inputs, hidden_state, num_gru_units, output_dim):
    batch_size, num_nodes = inputs.shape
    x = inputs.reshape(batch_size, num_nodes, 1)
    h = hidden_state.reshape(batch_size, num_nodes, num_gru_units)
    concatenation = jnp.concatenate([x, h], axis=2)
    concatenation = jnp.transpose(concatenation, (1, 2, 0)).reshape(
        num_nodes, (num_gru_units + 1) * batch_size)
    a_times_concat = lap @ concatenation
    a_times_concat = a_times_concat.reshape(num_nodes, num_gru_units + 1, batch_size)
    a_times_concat = jnp.transpose(a_times_concat, (2, 0, 1)).reshape(
        batch_size * num_nodes, num_gru_units + 1)
    outputs = a_times_concat @ weights + biases
    return outputs.reshape(batch_size, num_nodes * output_dim)


def tgcn_cell_ref(lap, w1, b1, w2, b2, inputs, hidden_state, hidden_dim):
    conc = jax.nn.sigmoid(_graph_conv_ref(lap, w1, b1, inputs, hidden_state,
                                          hidden_dim, 2 * hidden_dim))
    r, u = jnp.split(conc, 2, axis=1)
    c = jnp.tanh(_graph_conv_ref(lap, w2, b2, inputs, r * hidden_state,
                                 hidden_dim, hidden_dim))
    return u * hidden_state + (1.0 - u) * c


def xavier_uniform(key, fan_in, fan_out):
    bound = (6.0 / (fan_in + fan_out)) ** 0.5
    return jax.random.uniform(key, (fan_in, fan_out),
                              minval=-bound, maxval=bound, dtype=jnp.float32)


if __name__ == "__main__":
    B, N, H = 2, 16, 16   # batch, num_nodes (= input_dim), hidden_dim

    key = jax.random.PRNGKey(0)
    k_adj, k_x, k_h, k_w1, k_w2 = jax.random.split(key, 5)

    adj = jax.random.uniform(k_adj, (N, N), dtype=jnp.float32)
    inputs = jax.random.normal(k_x, (B, N), dtype=jnp.float32)
    hidden = 0.5 * jax.random.normal(k_h, (B, N * H), dtype=jnp.float32)

    lap = calculate_laplacian_with_self_loop(adj)

    # TGCNGraphConvolution parameters (conv1: bias init 1.0, conv2: bias init 0.0)
    w1 = xavier_uniform(k_w1, H + 1, 2 * H)
    b1 = jnp.full((2 * H,), 1.0, dtype=jnp.float32)
    w2 = xavier_uniform(k_w2, H + 1, H)
    b2 = jnp.zeros((H,), dtype=jnp.float32)

    cell = jax.jit(tgcn_cell_forward)
    new_h, new_h_again = cell(lap, w1, b1, w2, b2, inputs, hidden)
    jax.block_until_ready(new_h)

    assert new_h.shape == (B, N * H), new_h.shape
    assert bool(jnp.all(jnp.isfinite(new_h)))

    # Cross-check against the pure-JAX transcription of the PyTorch module
    # (bf16 laplacian / conv operands, f32 accumulation -> ~1e-3 max error).
    ref = tgcn_cell_ref(lap, w1, b1, w2, b2, inputs, hidden, H)
    max_err = float(jnp.max(jnp.abs(new_h - ref)))
    assert max_err < 1e-2, max_err

    print("KERNEL_OK")
</pallas_src>

<mosaic_0001>
module attributes {stable_mosaic.version = 11 : i64} {
  func.func @_tgcn_cell_kernel(%arg0: memref<16x8xbf16, #tpu.memory_space<vmem>>, %arg1: memref<16x8xbf16, #tpu.memory_space<vmem>>, %arg2: memref<8x32xbf16, #tpu.memory_space<vmem>>, %arg3: memref<8x32xbf16, #tpu.memory_space<vmem>>, %arg4: memref<8x32xbf16, #tpu.memory_space<vmem>>, %arg5: memref<8x32xbf16, #tpu.memory_space<vmem>>, %arg6: memref<8x32xf32, #tpu.memory_space<vmem>>, %arg7: memref<8x32xf32, #tpu.memory_space<vmem>>, %arg8: memref<2x8x32xf32, #tpu.memory_space<vmem>>, %arg9: memref<32x32xf32, #tpu.memory_space<vmem>>, %arg10: memref<1x32xf32, #tpu.memory_space<vmem>>, %arg11: memref<1x32xf32, #tpu.memory_space<vmem>>, %arg12: memref<1x32xf32, #tpu.memory_space<vmem>>, %arg13: memref<2x8x32xf32, #tpu.memory_space<vmem>>, %arg14: memref<16x32xf32, #tpu.memory_space<vmem>>) attributes {dimension_semantics = [], scalar_prefetch = 0 : i64, scratch_operands = 1 : i64, tpu.core_type = #tpu.core_type<tc>} {
    %c0 = arith.constant 0 : index
    %c0_0 = arith.constant 0 : index
    %0 = vector.load %arg0[%c0, %c0_0] : memref<16x8xbf16, #tpu.memory_space<vmem>>, vector<16x8xbf16>
    %c0_1 = arith.constant 0 : index
    %c0_2 = arith.constant 0 : index
    %1 = vector.load %arg1[%c0_1, %c0_2] : memref<16x8xbf16, #tpu.memory_space<vmem>>, vector<16x8xbf16>
    %c0_3 = arith.constant 0 : index
    %c0_4 = arith.constant 0 : index
    %c0_5 = arith.constant 0 : index
    %2 = vector.load %arg8[%c0_3, %c0_4, %c0_5] : memref<2x8x32xf32, #tpu.memory_space<vmem>>, vector<1x8x32xf32>
    %3 = vector.shape_cast %2 : vector<1x8x32xf32> to vector<8x32xf32>
    %c1 = arith.constant 1 : index
    %c0_6 = arith.constant 0 : index
    %c0_7 = arith.constant 0 : index
    %4 = vector.load %arg8[%c1, %c0_6, %c0_7] : memref<2x8x32xf32, #tpu.memory_space<vmem>>, vector<1x8x32xf32>
    %5 = vector.shape_cast %4 : vector<1x8x32xf32> to vector<8x32xf32>
    %c0_8 = arith.constant 0 : index
    %c0_9 = arith.constant 0 : index
    %6 = vector.load %arg2[%c0_8, %c0_9] : memref<8x32xbf16, #tpu.memory_space<vmem>>, vector<8x32xbf16>
    %cst = arith.constant dense<0.000000e+00> : vector<16x32xf32>
    %7 = tpu.matmul %0, %6, %cst {dimension_numbers = #tpu.dot_dimension_numbers<[1], [0], [0], [1], [0, 0, 1, 1], [], []>} : vector<16x8xbf16>, vector<8x32xbf16>, vector<16x32xf32> -> vector<16x32xf32>
    %c0_10 = arith.constant 0 : index
    %c0_11 = arith.constant 0 : index
    %8 = vector.load %arg3[%c0_10, %c0_11] : memref<8x32xbf16, #tpu.memory_space<vmem>>, vector<8x32xbf16>
    %cst_12 = arith.constant dense<0.000000e+00> : vector<16x32xf32>
    %9 = tpu.matmul %1, %8, %cst_12 {dimension_numbers = #tpu.dot_dimension_numbers<[1], [0], [0], [1], [0, 0, 1, 1], [], []>} : vector<16x8xbf16>, vector<8x32xbf16>, vector<16x32xf32> -> vector<16x32xf32>
    %10 = arith.addf %7, %9 : vector<16x32xf32>
    %c0_13 = arith.constant 0 : index
    %c0_14 = arith.constant 0 : index
    %11 = vector.load %arg10[%c0_13, %c0_14] : memref<1x32xf32, #tpu.memory_space<vmem>>, vector<1x32xf32>
    %12 = vector.broadcast %11 : vector<1x32xf32> to vector<16x32xf32>
    %13 = arith.addf %10, %12 : vector<16x32xf32>
    %14 = arith.negf %13 : vector<16x32xf32>
    %15 = math.exp %14 : vector<16x32xf32>
    %cst_15 = arith.constant 1.000000e+00 : f32
    %16 = vector.broadcast %cst_15 : f32 to vector<16x32xf32>
    %17 = arith.addf %16, %15 : vector<16x32xf32>
    %18 = arith.divf %16, %17 : vector<16x32xf32>
    %c0_16 = arith.constant 0 : index
    %c0_17 = arith.constant 0 : index
    %19 = vector.load %arg4[%c0_16, %c0_17] : memref<8x32xbf16, #tpu.memory_space<vmem>>, vector<8x32xbf16>
    %cst_18 = arith.constant dense<0.000000e+00> : vector<16x32xf32>
    %20 = tpu.matmul %0, %19, %cst_18 {dimension_numbers = #tpu.dot_dimension_numbers<[1], [0], [0], [1], [0, 0, 1, 1], [], []>} : vector<16x8xbf16>, vector<8x32xbf16>, vector<16x32xf32> -> vector<16x32xf32>
    %c0_19 = arith.constant 0 : index
    %c0_20 = arith.constant 0 : index
    %21 = vector.load %arg5[%c0_19, %c0_20] : memref<8x32xbf16, #tpu.memory_space<vmem>>, vector<8x32xbf16>
    %cst_21 = arith.constant dense<0.000000e+00> : vector<16x32xf32>
    %22 = tpu.matmul %1, %21, %cst_21 {dimension_numbers = #tpu.dot_dimension_numbers<[1], [0], [0], [1], [0, 0, 1, 1], [], []>} : vector<16x8xbf16>, vector<8x32xbf16>, vector<16x32xf32> -> vector<16x32xf32>
    %23 = arith.addf %20, %22 : vector<16x32xf32>
    %c0_22 = arith.constant 0 : index
    %c0_23 = arith.constant 0 : index
    %24 = vector.load %arg11[%c0_22, %c0_23] : memref<1x32xf32, #tpu.memory_space<vmem>>, vector<1x32xf32>
    %25 = vector.broadcast %24 : vector<1x32xf32> to vector<16x32xf32>
    %26 = arith.addf %23, %25 : vector<16x32xf32>
    %27 = arith.negf %26 : vector<16x32xf32>
    %28 = math.exp %27 : vector<16x32xf32>
    %cst_24 = arith.constant 1.000000e+00 : f32
    %29 = vector.broadcast %cst_24 : f32 to vector<16x32xf32>
    %30 = arith.addf %29, %28 : vector<16x32xf32>
    %31 = arith.divf %29, %30 : vector<16x32xf32>
    %32 = vector.extract_strided_slice %18 {offsets = [0, 0], sizes = [8, 32], strides = [1, 1]} : vector<16x32xf32> to vector<8x32xf32>
    %33 = vector.extract_strided_slice %18 {offsets = [8, 0], sizes = [8, 32], strides = [1, 1]} : vector<16x32xf32> to vector<8x32xf32>
    %34 = vector.extract_strided_slice %31 {offsets = [0, 0], sizes = [8, 32], strides = [1, 1]} : vector<16x32xf32> to vector<8x32xf32>
    %35 = vector.extract_strided_slice %31 {offsets = [8, 0], sizes = [8, 32], strides = [1, 1]} : vector<16x32xf32> to vector<8x32xf32>
    %36 = arith.mulf %32, %3 : vector<8x32xf32>
    %37 = arith.mulf %34, %5 : vector<8x32xf32>
    %c0_25 = arith.constant 0 : index
    %c0_26 = arith.constant 0 : index
    %38 = vector.load %arg9[%c0_25, %c0_26] : memref<32x32xf32, #tpu.memory_space<vmem>>, vector<32x32xf32>
    %cst_27 = arith.constant dense<0.000000e+00> : vector<8x32xf32>
    %39 = tpu.matmul %36, %38, %cst_27 {dimension_numbers = #tpu.dot_dimension_numbers<[1], [0], [0], [1], [0, 0, 1, 1], [], []>} : vector<8x32xf32>, vector<32x32xf32>, vector<8x32xf32> -> vector<8x32xf32>
    %c0_28 = arith.constant 0 : index
    %c0_29 = arith.constant 0 : index
    %40 = vector.load %arg6[%c0_28, %c0_29] : memref<8x32xf32, #tpu.memory_space<vmem>>, vector<8x32xf32>
    %41 = arith.addf %39, %40 : vector<8x32xf32>
    %42 = arith.truncf %41 : vector<8x32xf32> to vector<8x32xbf16>
    %cst_30 = arith.constant dense<0.000000e+00> : vector<8x32xf32>
    %43 = tpu.matmul %37, %38, %cst_30 {dimension_numbers = #tpu.dot_dimension_numbers<[1], [0], [0], [1], [0, 0, 1, 1], [], []>} : vector<8x32xf32>, vector<32x32xf32>, vector<8x32xf32> -> vector<8x32xf32>
    %c0_31 = arith.constant 0 : index
    %c0_32 = arith.constant 0 : index
    %44 = vector.load %arg7[%c0_31, %c0_32] : memref<8x32xf32, #tpu.memory_space<vmem>>, vector<8x32xf32>
    %45 = arith.addf %43, %44 : vector<8x32xf32>
    %46 = arith.truncf %45 : vector<8x32xf32> to vector<8x32xbf16>
    %cst_33 = arith.constant dense<0.000000e+00> : vector<16x32xf32>
    %47 = tpu.matmul %0, %42, %cst_33 {dimension_numbers = #tpu.dot_dimension_numbers<[1], [0], [0], [1], [0, 0, 1, 1], [], []>} : vector<16x8xbf16>, vector<8x32xbf16>, vector<16x32xf32> -> vector<16x32xf32>
    %cst_34 = arith.constant dense<0.000000e+00> : vector<16x32xf32>
    %48 = tpu.matmul %1, %46, %cst_34 {dimension_numbers = #tpu.dot_dimension_numbers<[1], [0], [0], [1], [0, 0, 1, 1], [], []>} : vector<16x8xbf16>, vector<8x32xbf16>, vector<16x32xf32> -> vector<16x32xf32>
    %49 = arith.addf %47, %48 : vector<16x32xf32>
    %c0_35 = arith.constant 0 : index
    %c0_36 = arith.constant 0 : index
    %50 = vector.load %arg14[%c0_35, %c0_36] : memref<16x32xf32, #tpu.memory_space<vmem>>, vector<16x32xf32>
    tpu.vector_store %arg14[%c0_35, %c0_36], %49 {strides = array<i32>} : memref<16x32xf32, #tpu.memory_space<vmem>>, vector<16x32xf32>,
    %c0_37 = arith.constant 0 : index
    %c0_38 = arith.constant 0 : index
    %51 = vector.load %arg12[%c0_37, %c0_38] : memref<1x32xf32, #tpu.memory_space<vmem>>, vector<1x32xf32>
    %c0_39 = arith.constant 0 : index
    %c0_40 = arith.constant 0 : index
    %52 = tpu.strided_load %arg14[%c0_39, %c0_40] {strides = array<i32: 2, 1>} : memref<16x32xf32, #tpu.memory_space<vmem>>, vector<8x32xf32>
    %53 = vector.broadcast %51 : vector<1x32xf32> to vector<8x32xf32>
    %54 = arith.addf %52, %53 : vector<8x32xf32>
    %55 = math.tanh %54 : vector<8x32xf32>
    %c1_41 = arith.constant 1 : index
    %c0_42 = arith.constant 0 : index
    %56 = tpu.strided_load %arg14[%c1_41, %c0_42] {strides = array<i32: 2, 1>} : memref<16x32xf32, #tpu.memory_space<vmem>>, vector<8x32xf32>
    %57 = vector.broadcast %51 : vector<1x32xf32> to vector<8x32xf32>
    %58 = arith.addf %56, %57 : vector<8x32xf32>
    %59 = math.tanh %58 : vector<8x32xf32>
    %60 = arith.mulf %33, %3 : vector<8x32xf32>
    %cst_43 = arith.constant 1.000000e+00 : f32
    %61 = vector.broadcast %cst_43 : f32 to vector<8x32xf32>
    %62 = arith.subf %61, %33 : vector<8x32xf32>
    %63 = arith.mulf %62, %55 : vector<8x32xf32>
    %64 = arith.addf %60, %63 : vector<8x32xf32>
    %c0_44 = arith.constant 0 : index
    %c0_45 = arith.constant 0 : index
    %c0_46 = arith.constant 0 : index
    %65 = vector.load %arg13[%c0_44, %c0_45, %c0_46] : memref<2x8x32xf32, #tpu.memory_space<vmem>>, vector<1x8x32xf32>
    %66 = vector.shape_cast %65 : vector<1x8x32xf32> to vector<8x32xf32>
    %67 = vector.shape_cast %64 : vector<8x32xf32> to vector<1x8x32xf32>
    tpu.vector_store %arg13[%c0_44, %c0_45, %c0_46], %67 {strides = array<i32>} : memref<2x8x32xf32, #tpu.memory_space<vmem>>, vector<1x8x32xf32>,
    %68 = arith.mulf %35, %5 : vector<8x32xf32>
    %cst_47 = arith.constant 1.000000e+00 : f32
    %69 = vector.broadcast %cst_47 : f32 to vector<8x32xf32>
    %70 = arith.subf %69, %35 : vector<8x32xf32>
    %71 = arith.mulf %70, %59 : vector<8x32xf32>
    %72 = arith.addf %68, %71 : vector<8x32xf32>
    %c1_48 = arith.constant 1 : index
    %c0_49 = arith.constant 0 : index
    %c0_50 = arith.constant 0 : index
    %73 = vector.load %arg13[%c1_48, %c0_49, %c0_50] : memref<2x8x32xf32, #tpu.memory_space<vmem>>, vector<1x8x32xf32>
    %74 = vector.shape_cast %73 : vector<1x8x32xf32> to vector<8x32xf32>
    %75 = vector.shape_cast %72 : vector<8x32xf32> to vector<1x8x32xf32>
    tpu.vector_store %arg13[%c1_48, %c0_49, %c0_50], %75 {strides = array<i32>} : memref<2x8x32xf32, #tpu.memory_space<vmem>>, vector<1x8x32xf32>,
    return
  }
}

</mosaic_0001>

<bundles_post_ra>
// kernel: tile.18
= control target key start
LH: loop header
LB: loop body
LE: loop exit
PB: predicated region body
PF: predicated region fallthrough
CT: control target
= control target key end

     0   :  { %s22_s0 = inlined_call_operand.vmem [shape: f32[16], index: 0, kind: input, shape index: {}]   ;;  %s23_s1 = inlined_call_operand.vmem [shape: f32[2,16], index: 1, kind: output, shape index: {}]  }
   0x1   :  { %v4_v0 = vld [vmem:[%s22_s0] ss:$0 sm:$0xff] }
   0x2   :  { %5 = vst [vmem:[%s23_s1] sm:$0x3] %v4_v0 }

// kernel: tile.19
= control target key start
LH: loop header
LB: loop body
LE: loop exit
PB: predicated region body
PF: predicated region fallthrough
CT: control target
= control target key end

     0   :  { %vm7_vm0 = vcmask 130048   ;;  %vm13_vm1 = vcmask 261248   ;;  %s39_s0 = inlined_call_operand.vmem [shape: f32[2,16], index: 0, kind: input, shape index: {}]   ;;  %s40_s1 = inlined_call_operand.vmem [shape: f32[1,32], index: 1, kind: output, shape index: {}]  }
   0x1   :  { %v4_v0 = vld [vmem:[%s39_s0] sm:$0x3]  ;;  %s22_s0 = smov 16  }
   0x2   :  { %5 = vst [vmem:[#allocation1] sm:$0x3] %v4_v0 }
   0x9   :  { %v10_v1 = vld [vmem:[#allocation1 + $0x1] sm:$0x1]   ;;  %v6_v2 = vld [vmem:[#allocation1] sm:$0x1]  }
   0xa   :  { %11 = vrot.lane.b32.xlu0 %v10_v1, %s22_s0  ;;  %8 = vst.msk [vmem:[#allocation0] sm:$0x1] %vm7_vm0, %v6_v2  }
  0x7c   :  { %v12_v3 = vpop.permute.xlu0 %11  }
  0x7d   :  { %14 = vst.msk [vmem:[#allocation0] sm:$0x1] %vm13_vm1, %v12_v3  }
  0x84   :  { %v17_v4 = vld [vmem:[#allocation0] sm:$0x1] }
  0x85   :  { %20 = vst [vmem:[%s40_s1] sm:$0x1] %v17_v4 }

// kernel: tgcn_cell_forward.1
= control target key start
LH: loop header
LB: loop body
LE: loop exit
PB: predicated region body
PF: predicated region fallthrough
CT: control target
= control target key end

     0   :  { %vm63_vm0 = vcmask 1043456   ;;  %vm59_vm1 = vcmask 64512   ;;  %vm237_vm6 = vcmask 261120   ;;  %s567_s3 = inlined_call_operand.vmem [shape: bf16[8,32], index: 3, kind: input, shape index: {}]   ;;  %s568_s2 = inlined_call_operand.vmem [shape: bf16[8,32], index: 2, kind: input, shape index: {}]   ;;  %s569_s5 = inlined_call_operand.vmem [shape: bf16[8,32], index: 5, kind: input, shape index: {}]   ;;  %s570_s4 = inlined_call_operand.vmem [shape: bf16[8,32], index: 4, kind: input, shape index: {}]   ;;  %s571_s1 = inlined_call_operand.vmem [shape: bf16[16,8], index: 1, kind: input, shape index: {}]   ;;  %s572_s0 = inlined_call_operand.vmem [shape: bf16[16,8], index: 0, kind: input, shape index: {}]   ;;  %s573_s10 = inlined_call_operand.vmem [shape: f32[1,32], index: 10, kind: input, shape index: {}]   ;;  %s574_s11 = inlined_call_operand.vmem [shape: f32[1,32], index: 11, kind: input, shape index: {}]   ;;  %s575_s9 = inlined_call_operand.vmem [shape: f32[32,32], index: 9, kind: input, shape index: {}]   ;;  %s576_s8 = inlined_call_operand.vmem [shape: f32[2,8,32], index: 8, kind: input, shape index: {}, may-alias: {8,13}]   ;;  %s577_s6 = inlined_call_operand.vmem [shape: f32[8,32], index: 6, kind: input, shape index: {}]   ;;  %s578_s7 = inlined_call_operand.vmem [shape: f32[8,32], index: 7, kind: input, shape index: {}]   ;;  %s579_s12 = inlined_call_operand.vmem [shape: f32[1,32], index: 12, kind: input, shape index: {}]   ;;  %s580_s13 = inlined_call_operand.vmem [shape: f32[2,8,32], index: 13, kind: output, shape index: {}, may-alias: {8,13}]  }
   0x1   :  { %v53_v0 = vld [vmem:[%s567_s3] sm:$0xf]  ;;  %v235_v10 = vld [vmem:[%s575_s9 + $0x18] sm:$0xff]  ;;  %v234_v11 = vld [vmem:[%s575_s9 + $0x10] sm:$0xff] }
   0x2   :  { %v52_v1 = vld [vmem:[%s568_s2] sm:$0xf]  ;;  %v65_v3 = vsel %vm63_vm0, %v53_v0, 0  ;;  %v233_v15 = vld [vmem:[%s575_s9 + $0x8] sm:$0xff] }
   0x3   :  { %v151_v2 = vld [vmem:[%s569_s5] sm:$0xf]  ;;  %v90_v4 = vsel %vm63_vm0, %v52_v1, 0  ;;  %74 = vmatpush.bf16.msra.mxu0 %v65_v3  ;;  %v534_v49 = vld [vmem:[%s576_s8 + $0x8] sm:$0xff] }
   0x4   :  { %v153_v5 = vsel %vm63_vm0, %v151_v2, 0  ;;  %v150_v6 = vld [vmem:[%s570_s4] sm:$0xf]  ;;  %99 = vmatpush.bf16.msra.mxu1 %v90_v4 }
   0x5   :  { %v484_v7 = vld [vmem:[%s571_s1] sm:$0xff]  ;;  %v170_v8 = vsel %vm63_vm0, %v150_v6, 0  ;;  %162 = vmatpush.bf16.msra.mxu2 %v153_v5 }
   0x6   :  { %v490_v9 = vld [vmem:[%s572_s0] sm:$0xff]  ;;  %179 = vmatpush.bf16.msra.mxu3 %v170_v8  ;;  %354 = vmatmul.msk.bf16.vlgmr.msra.gmra.mxu0 %vm59_vm1, %v484_v7 }
   0x7   :  { %359 = vmatmul.msk.bf16.vlgmr.msra.gmra.mxu1 %vm59_vm1, %v490_v9  ;;  %253 = vmatpush.msrb.mxu0 %v235_v10  ;;  %v509_v12 = vld [vmem:[%s573_s10] ss:$0 sm:$0xff] }
   0x8   :  { %362 = vmatmul.msk.bf16.vlgmr.msra.gmra.mxu2 %vm59_vm1, %v484_v7  ;;  %278 = vmatpush.msrb.mxu1 %v235_v10  ;;  %v232_v17 = vld [vmem:[%s575_s9] sm:$0xff] }
   0x9   :  { %363 = vmatmul.msk.bf16.vlgmr.msra.gmra.mxu3 %vm59_vm1, %v490_v9  ;;  %254 = vmatpush.msrb.mxu0 %v234_v11  ;;  %v521_v20 = vld [vmem:[%s574_s11] ss:$0 sm:$0xff] }
   0xa   :  { %279 = vmatpush.msrb.mxu1 %v234_v11  ;;  %v527_v39 = vld [vmem:[%s576_s8] sm:$0xff] }
   0xb   :  { %255 = vmatpush.msrb.mxu0 %v233_v15  ;;  %v236_v56 = vld [vmem:[%s577_s6] sm:$0xff] }
   0xc   :  { %280 = vmatpush.msrb.mxu1 %v233_v15  ;;  %v262_v60 = vld [vmem:[%s578_s7] sm:$0xff] }
   0xd   :  { %256 = vmatpush.msrb.mxu0 %v232_v17 }
   0xe   :  { %281 = vmatpush.msrb.mxu1 %v232_v17 }
  0x83   :  { %v76_v13 = vpop.f32.mrf.mxu0 }
  0x84   :  { %v101_v14 = vpop.f32.mrf.mxu1 }
  0x85   :  { %v102_v16 = vadd.f32 %v101_v14, %v76_v13 }
  0x87   :  { %v110_v18 = vadd.f32 %v509_v12, %v102_v16 }
  0x89   :  { %v360_v19 = vmul.f32 -1.442695, %v110_v18 }
  0x8b   :  { %376 = vpow2.f32 %v360_v19  ;;  %v164_v21 = vpop.f32.mrf.mxu2  ;;  %v78_v54 = vpop.f32.mrf.mxu0 }
  0x8c   :  { %v181_v22 = vpop.f32.mrf.mxu3  ;;  %v103_v55 = vpop.f32.mrf.mxu1 }
  0x8d   :  { %v182_v23 = vadd.f32 %v181_v22, %v164_v21  ;;  %v104_v4 = vadd.f32 %v103_v55, %v78_v54 }
  0x8f   :  { %v190_v24 = vadd.f32 %v521_v20, %v182_v23  ;;  %v111_v6 = vadd.f32 %v509_v12, %v104_v4 }
  0x91   :  { %v364_v25 = vmul.f32 -1.442695, %v190_v24  ;;  %v377_v26 = vpop.eup %376  ;;  %v361_v10 = vmul.f32 -1.442695, %v111_v6 }
  0x92   :  { %v118_v27 = vadd.f32 1.0, %v377_v26 }
  0x93   :  { %378 = vpow2.f32 %v364_v25  ;;  %v166_v2 = vpop.f32.mrf.mxu2 }
  0x94   :  { %380 = vrcp.f32 %v118_v27  ;;  %v131_v34 = vand.u32 2147483648, %v118_v27  ;;  %vm125_vm2 = vweird.f32 %v118_v27  ;;  %v129_v35 = vand.u32 2147483647, %v118_v27  ;;  %v183_v3 = vpop.f32.mrf.mxu3 }
  0x95   :  { %v184_v5 = vadd.f32 %v183_v3, %v166_v2 }
  0x96   :  { %v132_v40 = vor.u32 1.1754944e-38, %v131_v34  ;;  %vm130_vm5 = vcmp.eq.f32.partialorder %v129_v35, 8.507059e+37 }
  0x97   :  { %v191_v8 = vadd.f32 %v521_v20, %v184_v5 }
  0x99   :  { %v379_v28 = vpop.eup %378  ;;  %v365_v11 = vmul.f32 -1.442695, %v191_v8 }
  0x9a   :  { %v198_v29 = vadd.f32 1.0, %v379_v28  ;;  %v381_v30 = vpop.eup %380  ;;  %v375_v28 = vld [vmem:[%s579_s12] ss:$0 sm:$0xff] }
  0x9b   :  { %v121_v31 = vmul.f32 %v381_v30, %v118_v27  ;;  %vm126_vm3 = vweird.f32 %v381_v30 }
  0x9c   :  { %382 = vrcp.f32 %v198_v29  ;;  %vm127_vm4 = vmor %vm125_vm2, %vm126_vm3  ;;  %v211_v44 = vand.u32 2147483648, %v198_v29  ;;  %v209_v47 = vand.u32 2147483647, %v198_v29  ;;  %vm205_vm8 = vweird.f32 %v198_v29 }
  0x9d   :  { %v122_v32 = vsub.f32 1.0, %v121_v31  ;;  %384 = vpow2.f32 %v361_v10 }
  0x9e   :  { %v212_v50 = vor.u32 1.1754944e-38, %v211_v44  ;;  %vm210_vm10 = vcmp.eq.f32.partialorder %v209_v47, 8.507059e+37  ;;  %386 = vpow2.f32 %v365_v11 }
  0x9f   :  { %v123_v33 = vmul.f32 %v381_v30, %v122_v32 }
  0xa1   :  { %v124_v37 = vadd.f32 %v381_v30, %v123_v33 }
  0xa2   :  { %v383_v36 = vpop.eup %382 }
  0xa3   :  { %v201_v38 = vmul.f32 %v383_v36, %v198_v29  ;;  %v128_v42 = vsel %vm127_vm4, %v381_v30, %v124_v37  ;;  %vm206_vm7 = vweird.f32 %v383_v36  ;;  %v385_v13 = vpop.eup %384 }
  0xa4   :  { %v133_v43 = vsel %vm130_vm5, %v132_v40, %v128_v42  ;;  %vm207_vm9 = vmor %vm205_vm8, %vm206_vm7  ;;  %v119_v14 = vadd.f32 1.0, %v385_v13 }
  0xa5   :  { %v202_v41 = vsub.f32 1.0, %v201_v38  ;;  %v230_v45 = vmul.f32 %v133_v43, %v527_v39 }
  0xa6   :  { %388 = vrcp.f32 %v119_v14  ;;  %v146_v30 = vand.u32 2147483648, %v119_v14  ;;  %v144_v31 = vand.u32 2147483647, %v119_v14  ;;  %vm140_vm13 = vweird.f32 %v119_v14 }
  0xa7   :  { %v203_v46 = vmul.f32 %v383_v36, %v202_v41  ;;  %366 = vmatmul.msk.f32.vlgmr.msrb.gmra.mxu0 %vm237_vm6, %v230_v45 }
  0xa8   :  { %v147_v41 = vor.u32 1.1754944e-38, %v146_v30 }
  0xa9   :  { %v204_v48 = vadd.f32 %v383_v36, %v203_v46 }
  0xab   :  { %v208_v51 = vsel %vm207_vm9, %v383_v36, %v204_v48 }
  0xac   :  { %v213_v52 = vsel %vm210_vm10, %v212_v50, %v208_v51 }
  0xad   :  { %v231_v53 = vmul.f32 %v534_v49, %v213_v52 }
  0xaf   :  { %367 = vmatmul.msk.f32.vlgmr.msrb.gmra.mxu1 %vm237_vm6, %v231_v53 }
 0x124   :  { %v258_v57 = vpop.f32.mrf.mxu0 }
 0x125   :  { %v259_v58 = vadd.f32 %v258_v57, %v236_v56 }
 0x127   :  { %v261_v59 = vpack.c.bf16 %v259_v58, %v259_v58 }
 0x129   :  { %v305_v61 = vsel %vm63_vm0, %v261_v59, 0 }
 0x12a   :  { %314 = vmatpush.bf16.msrb.mxu3 %v305_v61 }
 0x12c   :  { %v283_v62 = vpop.f32.mrf.mxu1 }
 0x12d   :  { %v284_v63 = vadd.f32 %v283_v62, %v262_v60  ;;  %369 = vmatmul.msk.bf16.vlgmr.msrb.gmra.mxu3 %vm59_vm1, %v490_v9  ;;  %v387_v9 = vpop.eup %386 }
 0x12e   :  { %v199_v15 = vadd.f32 1.0, %v387_v9  ;;  %v389_v17 = vpop.eup %388 }
 0x12f   :  { %v286_v0 = vpack.c.bf16 %v284_v63, %v284_v63  ;;  %v136_v12 = vmul.f32 %v389_v17, %v119_v14  ;;  %vm141_vm11 = vweird.f32 %v389_v17 }
 0x130   :  { %390 = vrcp.f32 %v199_v15  ;;  %v226_v33 = vand.u32 2147483648, %v199_v15  ;;  %vm220_vm14 = vweird.f32 %v199_v15  ;;  %vm142_vm15 = vmor %vm140_vm13, %vm141_vm11  ;;  %v224_v36 = vand.u32 2147483647, %v199_v15 }
 0x131   :  { %v288_v1 = vsel %vm63_vm0, %v286_v0, 0  ;;  %v137_v20 = vsub.f32 1.0, %v136_v12 }
 0x132   :  { %297 = vmatpush.bf16.msrb.mxu2 %v288_v1  ;;  %v227_v43 = vor.u32 1.1754944e-38, %v226_v33  ;;  %vm225_vm2 = vcmp.eq.f32.partialorder %v224_v36, 8.507059e+37 }
 0x133   :  { %v138_v26 = vmul.f32 %v389_v17, %v137_v20 }
 0x135   :  { %368 = vmatmul.msk.bf16.vlgmr.msrb.gmra.mxu2 %vm59_vm1, %v484_v7  ;;  %v139_v29 = vadd.f32 %v389_v17, %v138_v26  ;;  %vm145_vm1 = vcmp.eq.f32.partialorder %v144_v31, 8.507059e+37 }
 0x136   :  { %v391_v19 = vpop.eup %390 }
 0x137   :  { %v216_v21 = vmul.f32 %v391_v19, %v199_v15  ;;  %vm221_vm12 = vweird.f32 %v391_v19  ;;  %v143_v40 = vsel %vm142_vm15, %v389_v17, %v139_v29 }
 0x138   :  { %vm222_vm0 = vmor %vm220_vm14, %vm221_vm12  ;;  %v148_v44 = vsel %vm145_vm1, %v147_v41, %v143_v40 }
 0x139   :  { %v217_v24 = vsub.f32 1.0, %v216_v21  ;;  %v335_v46 = vsub.f32 1.0, %v148_v44  ;;  %v334_v51 = vmul.f32 %v148_v44, %v527_v39 }
 0x13b   :  { %v218_v27 = vmul.f32 %v391_v19, %v217_v24 }
 0x13d   :  { %v219_v32 = vadd.f32 %v391_v19, %v218_v27 }
 0x13f   :  { %v223_v42 = vsel %vm222_vm0, %v391_v19, %v219_v32 }
 0x140   :  { %v228_v45 = vsel %vm225_vm2, %v227_v43, %v223_v42 }
 0x141   :  { %v340_v48 = vsub.f32 1.0, %v228_v45  ;;  %v339_v53 = vmul.f32 %v534_v49, %v228_v45 }
 0x1b0   :  { %v316_v16 = vpop.f32.mrf.mxu3 }
 0x1b8   :  { %v299_v7 = vpop.f32.mrf.mxu2  ;;  %v318_v23 = vpop.f32.mrf.mxu3 }
 0x1b9   :  { %v317_v18 = vadd.f32 %v316_v16, %v299_v7 }
 0x1bb   :  { %321 = vst.msk [vmem:[#allocation2] sm:$0xff] %vm237_vm6, %v317_v18 }
 0x1c0   :  { %v301_v22 = vpop.f32.mrf.mxu2 }
 0x1c1   :  { %v319_v25 = vadd.f32 %v318_v23, %v301_v22 }
 0x1c3   :  { %322 = vst.msk [vmem:[#allocation2 + $0x8] sm:$0xff] %vm237_vm6, %v319_v25 }
 0x1ca   :  { %v324_v34 = vld [vmem:[#allocation2] ss:$2 sm:$0xff]  ;;  %v331_v35 = vld [vmem:[#allocation2 + $0x1] ss:$2 sm:$0xff] }
 0x1cb   :  { %v328_v37 = vadd.f32 %v375_v28, %v324_v34  ;;  %v332_v38 = vadd.f32 %v375_v28, %v331_v35 }
 0x1cd   :  { %392 = vtanh.f32 %v328_v37 }
 0x1ce   :  { %394 = vtanh.f32 %v332_v38 }
 0x1d3   :  { %v393_v47 = vpop.eup %392 }
 0x1d4   :  { %v395_v50 = vpop.eup %394  ;;  %v336_v52 = vmul.f32 %v393_v47, %v335_v46 }
 0x1d5   :  { %v341_v54 = vmul.f32 %v395_v50, %v340_v48 }
 0x1d6   :  { %v337_v55 = vadd.f32 %v336_v52, %v334_v51 }
 0x1d7   :  { %v342_v56 = vadd.f32 %v341_v54, %v339_v53 }
 0x1d8   :  { %338 = vst.msk [vmem:[%s580_s13] sm:$0xff] %vm237_vm6, %v337_v55 }
 0x1d9   :  { %370 = vst.msk [vmem:[%s580_s13 + $0x8] sm:$0xff] %vm237_vm6, %v342_v56 }

</bundles_post_ra>
